<compile_context>
chip_gen: v5e
topology: v5e:2x2
jax: 0.10.0
libtpu: 0.0.40
codegen_flags: <defaults>
</compile_context>

<pallas_src>
import functools

import jax
import jax.numpy as jnp
from jax.experimental import pallas as pl
from jax.experimental.pallas import tpu as pltpu

LANE = 128  # TPU lane width (feature-dim padding)


def _round_up(x, m):
    return ((x + m - 1) // m) * m


def _pad2d(x, rows, cols):
    return jnp.pad(x, ((0, rows - x.shape[0]), (0, cols - x.shape[1])))


def _pad_nodes(n):
    return _round_up(n, 256)


def _row_tile(n_pad):
    # 512x512 A tiles when that still leaves >= 2 row tiles, so the "parallel"
    # row axis can split across v7x's two TensorCores; 256x256 otherwise.
    return 512 if (n_pad % 512 == 0 and n_pad // 512 >= 2) else 256


# ---------------------------------------------------------------------------
# Generation-aware VMEM budgets (v5e/v6e: 128 MiB, v7x: 64 MiB per TC).
# ---------------------------------------------------------------------------
def _vmem_capacity_bytes():
    try:
        cap = int(pltpu.get_tpu_info().vmem_capacity_bytes)
        return max(16 * 1024 * 1024, min(cap, 128 * 1024 * 1024))
    except Exception:
        return 64 * 1024 * 1024  # conservative (v7x-sized) fallback


_VMEM_CAP = _vmem_capacity_bytes()
_VMEM_LIMIT = (7 * _VMEM_CAP) // 8          # ~56 MiB (v7x) / ~112 MiB (v5e/v6e)
_FUSED_VMEM_BUDGET = (3 * _VMEM_CAP) // 4   # ~48 MiB (v7x) / ~96 MiB (v5e/v6e)
_TILED_VMEM_LIMIT = min(_VMEM_LIMIT, 64 * 1024 * 1024)


# ---------------------------------------------------------------------------
# Tiled per-layer kernel:  H_out = ReLU((A @ H) @ W + b)
#   grid = (row tiles of N_dst [parallel], src tiles of N_src [arbitrary])
# The f32 accumulator holds (A @ H) for one row tile; W/bias/ReLU are applied
# once at the last src tile (reassociation removes the old per-row-tile H@W
# recompute).
# ---------------------------------------------------------------------------
def _gcn_layer_tiled_kernel(a_ref, h_ref, w_ref, b_ref, o_ref, acc_ref):
    k = pl.program_id(1)

    @pl.when(k == 0)
    def _():
        acc_ref[...] = jnp.zeros_like(acc_ref)

    # (tm, tk) bf16 @ (tk, F_in) bf16 -> f32 accumulate on the MXU.
    acc_ref[...] += jnp.dot(a_ref[...], h_ref[...],
                            preferred_element_type=jnp.float32)

    @pl.when(k == pl.num_programs(1) - 1)
    def _():
        ah = acc_ref[...].astype(w_ref.dtype)          # bf16 MXU operand
        out = jnp.dot(ah, w_ref[...],
                      preferred_element_type=jnp.float32) + b_ref[...]
        o_ref[...] = jnp.maximum(out, 0.0).astype(o_ref.dtype)


def _gcn_layer_tiled(a_pad, h, w_p, b_p, out_dtype, tile):
    n_pad = a_pad.shape[0]
    f_in_p, f_out_p = w_p.shape
    grid = (n_pad // tile, n_pad // tile)
    # Per-step VMEM (double-buffered blocks + acc) at tile=512, F=128:
    #   A 2*512*512*2 + H 2*512*128*2 + W 2*128*128*2 + out 2*512*128*4
    #   + acc 512*128*4  ~= 1.6 MiB  -> far below every generation's limit.
    return pl.pallas_call(
        _gcn_layer_tiled_kernel,
        out_shape=jax.ShapeDtypeStruct((n_pad, f_out_p), out_dtype),
        grid=grid,
        in_specs=[
            pl.BlockSpec((tile, tile), lambda i, k: (i, k)),          # A tile
            pl.BlockSpec((tile, f_in_p), lambda i, k: (k, 0)),        # H src tile
            pl.BlockSpec((f_in_p, f_out_p), lambda i, k: (0, 0)),     # W (tiny)
            pl.BlockSpec((1, f_out_p), lambda i, k: (0, 0)),          # bias
        ],
        out_specs=pl.BlockSpec((tile, f_out_p), lambda i, k: (i, 0)),
        scratch_shapes=[pltpu.VMEM((tile, f_in_p), jnp.float32)],
        compiler_params=pltpu.CompilerParams(
            dimension_semantics=("parallel", "arbitrary"),
            vmem_limit_bytes=_TILED_VMEM_LIMIT),
    )(a_pad, h, w_p, b_p)


# ---------------------------------------------------------------------------
# Fused whole-stack kernel: grid axis = layer.  A and X live in HBM
# (memory_space=pl.ANY) and are DMA'd ONCE at layer 0 into single-copy VMEM
# scratch (X goes straight into the resident H buffer).  Only the tiny
# per-layer W / bias are pipelined.  A is read from HBM exactly once for all
# layers and H never round-trips through HBM.
# ---------------------------------------------------------------------------
def _gcn_fused_kernel(a_hbm, x_hbm, w_ref, b_ref, o_ref, a_vmem, h_vmem, sems):
    layer = pl.program_id(0)

    @pl.when(layer == 0)
    def _():
        cp_a = pltpu.make_async_copy(a_hbm, a_vmem, sems.at[0])
        cp_x = pltpu.make_async_copy(x_hbm, h_vmem, sems.at[1])
        cp_a.start()
        cp_x.start()
        cp_x.wait()
        cp_a.wait()

    # dropout(p) between layers is identity in eval mode.
    hw = jnp.dot(h_vmem[...], w_ref[0], preferred_element_type=jnp.float32)
    agg = jnp.dot(a_vmem[...], hw.astype(a_vmem.dtype),
                  preferred_element_type=jnp.float32)
    h_new = jnp.maximum(agg + b_ref[0], 0.0)
    h_vmem[...] = h_new.astype(h_vmem.dtype)

    @pl.when(layer == pl.num_programs(0) - 1)
    def _():
        o_ref[...] = h_new


def _gcn_stack_fused(a_pad, x_pad, w_stack, b_stack):
    n_pad = a_pad.shape[0]
    n_layers, f_max, _ = w_stack.shape
    return pl.pallas_call(
        _gcn_fused_kernel,
        out_shape=jax.ShapeDtypeStruct((n_pad, f_max), jnp.float32),
        grid=(n_layers,),
        in_specs=[
            pl.BlockSpec(memory_space=pl.ANY),                      # A (HBM)
            pl.BlockSpec(memory_space=pl.ANY),                      # X (HBM)
            pl.BlockSpec((1, f_max, f_max), lambda l: (l, 0, 0)),   # per-layer W
            pl.BlockSpec((1, 1, f_max), lambda l: (l, 0, 0)),       # per-layer b
        ],
        out_specs=pl.BlockSpec((n_pad, f_max), lambda l: (0, 0)),
        scratch_shapes=[
            pltpu.VMEM((n_pad, n_pad), jnp.bfloat16),   # A resident (single copy)
            pltpu.VMEM((n_pad, f_max), jnp.bfloat16),   # H resident
            pltpu.SemaphoreType.DMA((2,)),
        ],
        compiler_params=pltpu.CompilerParams(
            dimension_semantics=("arbitrary",),
            vmem_limit_bytes=_VMEM_LIMIT),
    )(a_pad, x_pad, w_stack, b_stack)


def _fused_vmem_estimate(n_pad, f_max):
    return (n_pad * n_pad * 2            # A scratch (bf16, single copy)
            + n_pad * f_max * 2          # H scratch (bf16, single copy)
            + 2 * n_pad * f_max * 4      # output block (f32, double-buffered)
            + 2 * f_max * f_max * 2      # per-layer W (double-buffered)
            + 2 * f_max * 4              # per-layer bias
            + (1 << 20))                 # slack for compiler-internal scratch


# ---------------------------------------------------------------------------
# Glue: GCN-normalized dense adjacency from edge_index [2, E]
# (PyG gcn_norm, add_self_loops=True, unit edge weights).  Existing self-loop
# edges are collapsed into exactly one unit self-loop per node, matching
# add_remaining_self_loops.
# ---------------------------------------------------------------------------
def build_normalized_adjacency(edge_index, num_nodes):
    src, dst = edge_index[0], edge_index[1]
    keep = (src != dst).astype(jnp.float32)
    adj = jnp.zeros((num_nodes, num_nodes), jnp.float32)
    adj = adj.at[dst, src].add(keep)               # rows = targets, cols = sources
    adj = adj + jnp.eye(num_nodes, dtype=jnp.float32)
    deg = adj.sum(axis=1)
    d_inv_sqrt = jnp.where(deg > 0, jax.lax.rsqrt(deg), 0.0)
    return d_inv_sqrt[:, None] * adj * d_inv_sqrt[None, :]


def prepare_adjacency(a_norm):
    """Pad + cast the normalized adjacency ONCE per graph (hoisted out of forward)."""
    n_pad = _pad_nodes(a_norm.shape[0])
    return _pad2d(a_norm, n_pad, n_pad).astype(jnp.bfloat16)


def init_gat_params(key, in_channels, hidden_channels, out_channels, n_layers):
    dims = [in_channels] + [hidden_channels] * (n_layers - 1) + [out_channels]
    params = []
    for li in range(n_layers):
        f_in, f_out = dims[li], dims[li + 1]
        key, wk = jax.random.split(key)
        scale = jnp.sqrt(2.0 / (f_in + f_out)).astype(jnp.float32)  # glorot-ish
        w = scale * jax.random.normal(wk, (f_in, f_out), jnp.float32)
        b = jnp.zeros((1, f_out), jnp.float32)
        params.append((w, b))
    return params


@functools.partial(jax.jit, static_argnames=("mode",))
def gat_forward(x, a_pad, params, *, mode="auto"):
    """Forward of the spec's `GAT` (stack of GCNConv + ReLU; eval-mode dropout).

    `a_pad` is the pre-padded bf16 adjacency from prepare_adjacency().
    """
    n = x.shape[0]
    n_pad = a_pad.shape[0]
    tile = _row_tile(n_pad)
    out_channels = params[-1][0].shape[1]
    dims = [params[0][0].shape[0]] + [w.shape[1] for (w, _) in params]
    f_max = max(_round_up(d, LANE) for d in dims)

    if mode == "auto":
        mode = ("fused" if _fused_vmem_estimate(n_pad, f_max) <= _FUSED_VMEM_BUDGET
                else "tiled")

    if mode == "fused":
        x_pad = _pad2d(x, n_pad, f_max).astype(jnp.bfloat16)
        w_stack = jnp.stack(
            [_pad2d(w, f_max, f_max) for (w, _) in params]).astype(jnp.bfloat16)
        b_stack = jnp.stack([_pad2d(b, 1, f_max) for (_, b) in params])
        out = _gcn_stack_fused(a_pad, x_pad, w_stack, b_stack)
    else:
        h = _pad2d(x, n_pad, _round_up(dims[0], LANE)).astype(jnp.bfloat16)
        for li, (w, b) in enumerate(params):
            f_in_p = _round_up(w.shape[0], LANE)
            f_out_p = _round_up(w.shape[1], LANE)
            w_p = _pad2d(w, f_in_p, f_out_p).astype(jnp.bfloat16)
            b_p = _pad2d(b, 1, f_out_p)
            last = li == len(params) - 1
            h = _gcn_layer_tiled(a_pad, h, w_p, b_p,
                                 jnp.float32 if last else jnp.bfloat16, tile)
        out = h

    return out[:n, :out_channels]


# ---------------------------------------------------------------------------
# References.
# ---------------------------------------------------------------------------
def gat_reference_bf16(x, a_norm, params):
    """Pure-JAX reference using the same bf16 quantization points as the kernels."""
    a_bf = a_norm.astype(jnp.bfloat16)
    h = x.astype(jnp.bfloat16)
    out = None
    for (w, b) in params:
        agg = jnp.dot(a_bf, h, preferred_element_type=jnp.float32)
        out = jnp.maximum(
            jnp.dot(agg.astype(jnp.bfloat16), w.astype(jnp.bfloat16),
                    preferred_element_type=jnp.float32) + b, 0.0)
        h = out.astype(jnp.bfloat16)
    return out


def gat_reference_f32(x, a_norm, params):
    """Full-f32 reference (what PyTorch would compute, up to fp32 rounding)."""
    h = x
    for (w, b) in params:
        h = jnp.maximum(a_norm @ (h @ w) + b, 0.0)
    return h


if __name__ == "__main__":
    key = jax.random.PRNGKey(0)
    in_channels, hidden_channels, out_channels, n_layers = 8, 32, 4, 3
    keys = jax.random.split(key, 10)
    params = init_gat_params(keys[0], in_channels, hidden_channels,
                             out_channels, n_layers)

    def make_graph(kx, ke1, ke2, n, e):
        x = jax.random.normal(kx, (n, in_channels), jnp.float32)
        src = jax.random.randint(ke1, (e,), 0, n, jnp.int32)
        dst = jax.random.randint(ke2, (e,), 0, n, jnp.int32)
        a = build_normalized_adjacency(jnp.stack([src, dst], axis=0), n)
        return x, a

    def check(x, a_norm, modes):
        a_pad = prepare_adjacency(a_norm)
        ref_bf = gat_reference_bf16(x, a_norm, params)
        ref_f32 = gat_reference_f32(x, a_norm, params)
        jax.block_until_ready((ref_bf, ref_f32))
        for mode in modes:
            out = gat_forward(x, a_pad, params, mode=mode)
            jax.block_until_ready(out)
            assert out.shape == (x.shape[0], out_channels), (mode, out.shape)
            assert bool(jnp.all(out >= 0.0)), mode
            assert bool(jnp.allclose(out, ref_bf, rtol=2e-2, atol=2e-2)), mode
            assert bool(jnp.allclose(out, ref_f32, rtol=5e-2, atol=5e-2)), mode

    # Graph 1: tiny demo (toy sizes of the original module) — both paths.
    x1, a1 = make_graph(keys[1], keys[2], keys[3], 16, 48)
    check(x1, a1, ("fused", "tiled"))

    # Graph 2: exercises the multi-tile accumulator grid (n_pad=512, 256-tiles).
    x2, a2 = make_graph(keys[4], keys[5], keys[6], 300, 1500)
    check(x2, a2, ("tiled",))

    # Graph 3: exercises 512x512 tiles (n_pad=1024, 2 row tiles) and the
    # auto heuristic (resolves to fused A-residency).
    x3, a3 = make_graph(keys[7], keys[8], keys[9], 1000, 5000)
    check(x3, a3, ("tiled", "auto"))

    print("KERNEL_OK")
</pallas_src>

<mosaic_0001>
module attributes {stable_mosaic.version = 11 : i64} {
  func.func @_gcn_fused_kernel(%arg0: i32, %arg1: memref<256x256xbf16, #tpu.memory_space<any>>, %arg2: memref<256x128xbf16, #tpu.memory_space<any>>, %arg3: memref<1x128x128xbf16, #tpu.memory_space<vmem>>, %arg4: memref<1x1x128xf32, #tpu.memory_space<vmem>>, %arg5: memref<256x128xf32, #tpu.memory_space<vmem>>, %arg6: memref<256x256xbf16, #tpu.memory_space<vmem>>, %arg7: memref<256x128xbf16, #tpu.memory_space<vmem>>, %arg8: memref<2x!tpu.dma_semaphore, #tpu.memory_space<semaphore_mem>>) attributes {dimension_semantics = [#tpu.dimension_semantics<arbitrary>], iteration_bounds = array<i64: 3>, scalar_prefetch = 0 : i64, scratch_operands = 3 : i64, tpu.core_type = #tpu.core_type<tc>, window_params = [{}, {}, {transform_indices = @transform_2, window_bounds = array<i64: 1, 128, 128>}, {transform_indices = @transform_3, window_bounds = array<i64: 1, 1, 128>}, {pipeline_mode = #tpu.pipeline_mode<synchronous>, transform_indices = @transform_4, window_bounds = array<i64: 256, 128>}]} {
    %c0_i32 = arith.constant 0 : i32
    %0 = arith.cmpi eq, %arg0, %c0_i32 : i32
    %1 = arith.extui %0 : i1 to i32
    %c0_i32_0 = arith.constant 0 : i32
    %2 = arith.cmpi ne, %1, %c0_i32_0 : i32
    scf.if %2 {
      %c0_i32_15 = arith.constant 0 : i32
      %21 = tpu.memref_slice %arg8[%c0_i32_15] : memref<2x!tpu.dma_semaphore, #tpu.memory_space<semaphore_mem>> -> memref<1x!tpu.dma_semaphore, #tpu.memory_space<semaphore_mem>>
      %22 = tpu.memref_squeeze %21 : memref<1x!tpu.dma_semaphore, #tpu.memory_space<semaphore_mem>> -> memref<!tpu.dma_semaphore, #tpu.memory_space<semaphore_mem>>
      tpu.enqueue_dma source(%arg1 : memref<256x256xbf16, #tpu.memory_space<any>>) target(%arg6 : memref<256x256xbf16, #tpu.memory_space<vmem>>) target_semaphore(%22 : memref<!tpu.dma_semaphore, #tpu.memory_space<semaphore_mem>>)
      %c1_i32 = arith.constant 1 : i32
      %23 = tpu.memref_slice %arg8[%c1_i32] : memref<2x!tpu.dma_semaphore, #tpu.memory_space<semaphore_mem>> -> memref<1x!tpu.dma_semaphore, #tpu.memory_space<semaphore_mem>>
      %24 = tpu.memref_squeeze %23 : memref<1x!tpu.dma_semaphore, #tpu.memory_space<semaphore_mem>> -> memref<!tpu.dma_semaphore, #tpu.memory_space<semaphore_mem>>
      tpu.enqueue_dma source(%arg2 : memref<256x128xbf16, #tpu.memory_space<any>>) target(%arg7 : memref<256x128xbf16, #tpu.memory_space<vmem>>) target_semaphore(%24 : memref<!tpu.dma_semaphore, #tpu.memory_space<semaphore_mem>>)
      %c1_i32_16 = arith.constant 1 : i32
      %25 = tpu.memref_slice %arg8[%c1_i32_16] : memref<2x!tpu.dma_semaphore, #tpu.memory_space<semaphore_mem>> -> memref<1x!tpu.dma_semaphore, #tpu.memory_space<semaphore_mem>>
      %26 = tpu.memref_squeeze %25 : memref<1x!tpu.dma_semaphore, #tpu.memory_space<semaphore_mem>> -> memref<!tpu.dma_semaphore, #tpu.memory_space<semaphore_mem>>
      tpu.wait_dma2 semaphore(%26 : memref<!tpu.dma_semaphore, #tpu.memory_space<semaphore_mem>>) src(%arg2 : memref<256x128xbf16, #tpu.memory_space<any>>) dst(%arg7 : memref<256x128xbf16, #tpu.memory_space<vmem>>)
      %c0_i32_17 = arith.constant 0 : i32
      %27 = tpu.memref_slice %arg8[%c0_i32_17] : memref<2x!tpu.dma_semaphore, #tpu.memory_space<semaphore_mem>> -> memref<1x!tpu.dma_semaphore, #tpu.memory_space<semaphore_mem>>
      %28 = tpu.memref_squeeze %27 : memref<1x!tpu.dma_semaphore, #tpu.memory_space<semaphore_mem>> -> memref<!tpu.dma_semaphore, #tpu.memory_space<semaphore_mem>>
      tpu.wait_dma2 semaphore(%28 : memref<!tpu.dma_semaphore, #tpu.memory_space<semaphore_mem>>) src(%arg1 : memref<256x256xbf16, #tpu.memory_space<any>>) dst(%arg6 : memref<256x256xbf16, #tpu.memory_space<vmem>>)
    } else {
    }
    %c0 = arith.constant 0 : index
    %c0_1 = arith.constant 0 : index
    %3 = vector.load %arg7[%c0, %c0_1] : memref<256x128xbf16, #tpu.memory_space<vmem>>, vector<256x128xbf16>
    %c0_2 = arith.constant 0 : index
    %c0_3 = arith.constant 0 : index
    %c0_4 = arith.constant 0 : index
    %4 = vector.load %arg3[%c0_2, %c0_3, %c0_4] : memref<1x128x128xbf16, #tpu.memory_space<vmem>>, vector<1x128x128xbf16>
    %5 = vector.shape_cast %4 : vector<1x128x128xbf16> to vector<128x128xbf16>
    %cst = arith.constant dense<0.000000e+00> : vector<256x128xf32>
    %6 = tpu.matmul %3, %5, %cst {dimension_numbers = #tpu.dot_dimension_numbers<[1], [0], [0], [1], [0, 0, 1, 1], [], []>} : vector<256x128xbf16>, vector<128x128xbf16>, vector<256x128xf32> -> vector<256x128xf32>
    %c0_5 = arith.constant 0 : index
    %c0_6 = arith.constant 0 : index
    %7 = vector.load %arg6[%c0_5, %c0_6] : memref<256x256xbf16, #tpu.memory_space<vmem>>, vector<256x256xbf16>
    %8 = arith.truncf %6 : vector<256x128xf32> to vector<256x128xbf16>
    %cst_7 = arith.constant dense<0.000000e+00> : vector<256x128xf32>
    %9 = tpu.matmul %7, %8, %cst_7 {dimension_numbers = #tpu.dot_dimension_numbers<[1], [0], [0], [1], [0, 0, 1, 1], [], []>} : vector<256x256xbf16>, vector<256x128xbf16>, vector<256x128xf32> -> vector<256x128xf32>
    %c0_8 = arith.constant 0 : index
    %c0_9 = arith.constant 0 : index
    %c0_10 = arith.constant 0 : index
    %10 = vector.load %arg4[%c0_8, %c0_9, %c0_10] : memref<1x1x128xf32, #tpu.memory_space<vmem>>, vector<1x1x128xf32>
    %11 = vector.shape_cast %10 : vector<1x1x128xf32> to vector<1x128xf32>
    %12 = vector.broadcast %11 : vector<1x128xf32> to vector<256x128xf32>
    %13 = arith.addf %9, %12 : vector<256x128xf32>
    %cst_11 = arith.constant 0.000000e+00 : f32
    %14 = vector.broadcast %cst_11 : f32 to vector<256x128xf32>
    %15 = arith.maximumf %13, %14 : vector<256x128xf32>
    %16 = arith.truncf %15 : vector<256x128xf32> to vector<256x128xbf16>
    %c0_12 = arith.constant 0 : index
    %c0_13 = arith.constant 0 : index
    %17 = vector.load %arg7[%c0_12, %c0_13] : memref<256x128xbf16, #tpu.memory_space<vmem>>, vector<256x128xbf16>
    tpu.vector_store %arg7[%c0_12, %c0_13], %16 {strides = array<i32>} : memref<256x128xbf16, #tpu.memory_space<vmem>>, vector<256x128xbf16>,
    %c2_i32 = arith.constant 2 : i32
    %18 = arith.cmpi eq, %arg0, %c2_i32 : i32
    %19 = arith.extui %18 : i1 to i32
    %c0_i32_14 = arith.constant 0 : i32
    %20 = arith.cmpi ne, %19, %c0_i32_14 : i32
    scf.if %20 {
      %c0_15 = arith.constant 0 : index
      %c0_16 = arith.constant 0 : index
      %21 = vector.load %arg5[%c0_15, %c0_16] : memref<256x128xf32, #tpu.memory_space<vmem>>, vector<256x128xf32>
      tpu.vector_store %arg5[%c0_15, %c0_16], %15 {strides = array<i32>} : memref<256x128xf32, #tpu.memory_space<vmem>>, vector<256x128xf32>,
    } else {
    }
    return
  }
  func.func @transform_2(%arg0: i32) -> (i32, i32, i32) {
    %c0_i32 = arith.constant 0 : i32
    %c0_i32_0 = arith.constant 0 : i32
    %c0_i32_1 = arith.constant 0 : i32
    return %arg0, %c0_i32, %c0_i32_0 : i32, i32, i32
  }
  func.func @transform_3(%arg0: i32) -> (i32, i32, i32) {
    %c0_i32 = arith.constant 0 : i32
    %c0_i32_0 = arith.constant 0 : i32
    %c0_i32_1 = arith.constant 0 : i32
    return %arg0, %c0_i32, %c0_i32_0 : i32, i32, i32
  }
  func.func @transform_4(%arg0: i32) -> (i32, i32) {
    %c0_i32 = arith.constant 0 : i32
    %c0_i32_0 = arith.constant 0 : i32
    %c0_i32_1 = arith.constant 0 : i32
    return %c0_i32, %c0_i32_0 : i32, i32
  }
}

</mosaic_0001>

<bundles_post_ra>
// kernel: gat_forward.1
= control target key start
LH: loop header
LB: loop body
LE: loop exit
PB: predicated region body
PF: predicated region fallthrough
CT: control target
= control target key end

     0   :  { %s1604_s15 = smov 0   ;;  %s2112_s0 = inlined_call_operand.vmem [shape: bf16[256,256], index: 0, kind: input, shape index: {}]   ;;  %s2113_s1 = inlined_call_operand.vmem [shape: bf16[256,128], index: 1, kind: input, shape index: {}]   ;;  %s2114_s2 = inlined_call_operand.vmem [shape: bf16[3,128,128], index: 2, kind: input, shape index: {}]   ;;  %s2115_s3 = inlined_call_operand.vmem [shape: f32[3,1,128], index: 3, kind: input, shape index: {}]   ;;  %s2116_s4 = inlined_call_operand.vmem [shape: f32[256,128], index: 4, kind: output, shape index: {}]  }
   0x1 LB: > { %s1610_s16 = sadd.s32 4294967295, %s1577_s15   ;;  %p1149_p0 = scmp.ge.s32.totalorder %s1577_s15, 1  ;;  %s1577_s15 = sphi %s1604_s15, %s14_s15  }
   0x2   : > { %p117_p1 = scmp.lt.s32.totalorder %s1577_s15, 4 }
   0x4   : > { %p118_p2 = pnand %p1149_p0, %p117_p1 }
   0x5   : > { %p137_p3 = scmp.lt.s32.totalorder (!%p118_p2), %s1610_s16, 2  ;;  %p1152_p4 = scmp.ne.s32.totalorder (!%p118_p2), %s1610_s16, 0 }
   0x6   : > { %121 = sbr.rel (%p118_p2) target bundleno = 786 (0x312), region = 28 }
   0xb   : > { %s1616_s17 = scalar_select %p137_p3, %s1610_s16, 2 }
   0xc   : > { %148 = sbr.rel (%p1152_p4) target bundleno = 72 (0x48), region = 32 }
   0xd   : > { %s1382_s18 = sshll.u32 %s1616_s17, 6  ;;  %s144_s21 = scalar_lea.vmem %s2115_s3, %s1616_s17 }
   0xe   : > { %s1626_s24 = scalar_lea.vmem %s2114_s2, %s1382_s18 }
  0x11   : > { %v159_v0 = vld [vmem:[%s2112_s0] sm:$0xff]  ;;  %v161_v1 = vld [vmem:[%s2112_s0 + $0x8] sm:$0xff]  ;;  %v163_v2 = vld [vmem:[%s2112_s0 + $0x10] sm:$0xff] }
  0x12   : > { %160 = vst [vmem:[#allocation2] sm:$0xff] %v159_v0  ;;  %v165_v3 = vld [vmem:[%s2112_s0 + $0x18] sm:$0xff]  ;;  %v167_v4 = vld [vmem:[%s2112_s0 + $0x20] sm:$0xff]  ;;  %v169_v5 = vld [vmem:[%s2112_s0 + $0x28] sm:$0xff] }
  0x13   : > { %162 = vst [vmem:[#allocation2 + $0x8] sm:$0xff] %v161_v1  ;;  %v171_v6 = vld [vmem:[%s2112_s0 + $0x30] sm:$0xff]  ;;  %v173_v7 = vld [vmem:[%s2112_s0 + $0x38] sm:$0xff]  ;;  %v175_v8 = vld [vmem:[%s2112_s0 + $0x40] sm:$0xff] }
  0x14   : > { %164 = vst [vmem:[#allocation2 + $0x10] sm:$0xff] %v163_v2  ;;  %v177_v9 = vld [vmem:[%s2112_s0 + $0x48] sm:$0xff]  ;;  %v179_v10 = vld [vmem:[%s2112_s0 + $0x50] sm:$0xff]  ;;  %v181_v11 = vld [vmem:[%s2112_s0 + $0x58] sm:$0xff] }
  0x15   : > { %166 = vst [vmem:[#allocation2 + $0x18] sm:$0xff] %v165_v3  ;;  %v183_v12 = vld [vmem:[%s2112_s0 + $0x60] sm:$0xff]  ;;  %v185_v13 = vld [vmem:[%s2112_s0 + $0x68] sm:$0xff]  ;;  %v187_v14 = vld [vmem:[%s2112_s0 + $0x70] sm:$0xff] }
  0x16   : > { %168 = vst [vmem:[#allocation2 + $0x20] sm:$0xff] %v167_v4  ;;  %v189_v15 = vld [vmem:[%s2112_s0 + $0x78] sm:$0xff]  ;;  %v191_v16 = vld [vmem:[%s2112_s0 + $0x80] sm:$0xff]  ;;  %v193_v17 = vld [vmem:[%s2112_s0 + $0x88] sm:$0xff] }
  0x17   : > { %170 = vst [vmem:[#allocation2 + $0x28] sm:$0xff] %v169_v5  ;;  %v195_v18 = vld [vmem:[%s2112_s0 + $0x90] sm:$0xff]  ;;  %v197_v19 = vld [vmem:[%s2112_s0 + $0x98] sm:$0xff]  ;;  %v199_v20 = vld [vmem:[%s2112_s0 + $0xa0] sm:$0xff] }
  0x18   : > { %172 = vst [vmem:[#allocation2 + $0x30] sm:$0xff] %v171_v6  ;;  %v201_v21 = vld [vmem:[%s2112_s0 + $0xa8] sm:$0xff]  ;;  %v203_v22 = vld [vmem:[%s2112_s0 + $0xb0] sm:$0xff]  ;;  %v205_v23 = vld [vmem:[%s2112_s0 + $0xb8] sm:$0xff] }
  0x19   : > { %174 = vst [vmem:[#allocation2 + $0x38] sm:$0xff] %v173_v7  ;;  %v207_v24 = vld [vmem:[%s2112_s0 + $0xc0] sm:$0xff]  ;;  %v209_v25 = vld [vmem:[%s2112_s0 + $0xc8] sm:$0xff]  ;;  %v211_v26 = vld [vmem:[%s2112_s0 + $0xd0] sm:$0xff] }
  0x1a   : > { %176 = vst [vmem:[#allocation2 + $0x40] sm:$0xff] %v175_v8  ;;  %v213_v27 = vld [vmem:[%s2112_s0 + $0xd8] sm:$0xff]  ;;  %v215_v28 = vld [vmem:[%s2112_s0 + $0xe0] sm:$0xff]  ;;  %v217_v29 = vld [vmem:[%s2112_s0 + $0xe8] sm:$0xff] }
  0x1b   : > { %178 = vst [vmem:[#allocation2 + $0x48] sm:$0xff] %v177_v9  ;;  %v219_v30 = vld [vmem:[%s2112_s0 + $0xf0] sm:$0xff]  ;;  %v221_v31 = vld [vmem:[%s2112_s0 + $0xf8] sm:$0xff] }
  0x1c   : > { %180 = vst [vmem:[#allocation2 + $0x50] sm:$0xff] %v179_v10 }
  0x1d   : > { %182 = vst [vmem:[#allocation2 + $0x58] sm:$0xff] %v181_v11 }
  0x1e   : > { %184 = vst [vmem:[#allocation2 + $0x60] sm:$0xff] %v183_v12 }
  0x1f   : > { %186 = vst [vmem:[#allocation2 + $0x68] sm:$0xff] %v185_v13 }
  0x20   : > { %188 = vst [vmem:[#allocation2 + $0x70] sm:$0xff] %v187_v14 }
  0x21   : > { %190 = vst [vmem:[#allocation2 + $0x78] sm:$0xff] %v189_v15 }
  0x22   : > { %192 = vst [vmem:[#allocation2 + $0x80] sm:$0xff] %v191_v16 }
  0x23   : > { %194 = vst [vmem:[#allocation2 + $0x88] sm:$0xff] %v193_v17 }
  0x24   : > { %196 = vst [vmem:[#allocation2 + $0x90] sm:$0xff] %v195_v18 }
  0x25   : > { %198 = vst [vmem:[#allocation2 + $0x98] sm:$0xff] %v197_v19 }
  0x26   : > { %200 = vst [vmem:[#allocation2 + $0xa0] sm:$0xff] %v199_v20 }
  0x27   : > { %202 = vst [vmem:[#allocation2 + $0xa8] sm:$0xff] %v201_v21 }
  0x28   : > { %204 = vst [vmem:[#allocation2 + $0xb0] sm:$0xff] %v203_v22 }
  0x29   : > { %206 = vst [vmem:[#allocation2 + $0xb8] sm:$0xff] %v205_v23 }
  0x2a   : > { %208 = vst [vmem:[#allocation2 + $0xc0] sm:$0xff] %v207_v24 }
  0x2b   : > { %210 = vst [vmem:[#allocation2 + $0xc8] sm:$0xff] %v209_v25 }
  0x2c   : > { %212 = vst [vmem:[#allocation2 + $0xd0] sm:$0xff] %v211_v26 }
  0x2d   : > { %214 = vst [vmem:[#allocation2 + $0xd8] sm:$0xff] %v213_v27 }
  0x2e   : > { %216 = vst [vmem:[#allocation2 + $0xe0] sm:$0xff] %v215_v28 }
  0x2f   : > { %218 = vst [vmem:[#allocation2 + $0xe8] sm:$0xff] %v217_v29 }
  0x30   : > { %220 = vst [vmem:[#allocation2 + $0xf0] sm:$0xff] %v219_v30 }
  0x31   : > { %222 = vst [vmem:[#allocation2 + $0xf8] sm:$0xff] %v221_v31 }
  0x32   : > { %228 = vsyncadd [#allocation4], 4096  ;;  %v240_v32 = vld [vmem:[%s2113_s1] sm:$0xff]  ;;  %v242_v33 = vld [vmem:[%s2113_s1 + $0x8] sm:$0xff] }
  0x33   : > { %241 = vst [vmem:[#allocation3 + $0x30] sm:$0xff] %v240_v32  ;;  %v244_v34 = vld [vmem:[%s2113_s1 + $0x10] sm:$0xff]  ;;  %v246_v35 = vld [vmem:[%s2113_s1 + $0x18] sm:$0xff]  ;;  %v248_v36 = vld [vmem:[%s2113_s1 + $0x20] sm:$0xff] }
  0x34   : > { %243 = vst [vmem:[#allocation3] sm:$0xff] %v242_v33  ;;  %v250_v37 = vld [vmem:[%s2113_s1 + $0x28] sm:$0xff]  ;;  %v252_v38 = vld [vmem:[%s2113_s1 + $0x30] sm:$0xff]  ;;  %v254_v39 = vld [vmem:[%s2113_s1 + $0x38] sm:$0xff] }
  0x35   : > { %245 = vst [vmem:[#allocation3 + $0x58] sm:$0xff] %v244_v34  ;;  %v256_v40 = vld [vmem:[%s2113_s1 + $0x40] sm:$0xff]  ;;  %v258_v41 = vld [vmem:[%s2113_s1 + $0x48] sm:$0xff]  ;;  %v260_v42 = vld [vmem:[%s2113_s1 + $0x50] sm:$0xff] }
  0x36   : > { %247 = vst [vmem:[#allocation3 + $0x18] sm:$0xff] %v246_v35  ;;  %v262_v43 = vld [vmem:[%s2113_s1 + $0x58] sm:$0xff]  ;;  %v264_v44 = vld [vmem:[%s2113_s1 + $0x60] sm:$0xff]  ;;  %v266_v45 = vld [vmem:[%s2113_s1 + $0x68] sm:$0xff] }
  0x37   : > { %249 = vst [vmem:[#allocation3 + $0x50] sm:$0xff] %v248_v36  ;;  %v268_v46 = vld [vmem:[%s2113_s1 + $0x70] sm:$0xff]  ;;  %v270_v47 = vld [vmem:[%s2113_s1 + $0x78] sm:$0xff] }
  0x38   : > { %251 = vst [vmem:[#allocation3 + $0x68] sm:$0xff] %v250_v37 }
  0x39   : > { %253 = vst [vmem:[#allocation3 + $0x8] sm:$0xff] %v252_v38 }
  0x3a   : > { %255 = vst [vmem:[#allocation3 + $0x48] sm:$0xff] %v254_v39 }
  0x3b   : > { %257 = vst [vmem:[#allocation3 + $0x40] sm:$0xff] %v256_v40 }
  0x3c   : > { %259 = vst [vmem:[#allocation3 + $0x20] sm:$0xff] %v258_v41 }
  0x3d   : > { %261 = vst [vmem:[#allocation3 + $0x10] sm:$0xff] %v260_v42 }
  0x3e   : > { %263 = vst [vmem:[#allocation3 + $0x38] sm:$0xff] %v262_v43 }
  0x3f   : > { %265 = vst [vmem:[#allocation3 + $0x60] sm:$0xff] %v264_v44 }
  0x40   : > { %267 = vst [vmem:[#allocation3 + $0x70] sm:$0xff] %v266_v45 }
  0x41   : > { %269 = vst [vmem:[#allocation3 + $0x78] sm:$0xff] %v268_v46 }
  0x42   : > { %271 = vst [vmem:[#allocation3 + $0x28] sm:$0xff] %v270_v47 }
  0x43   : > { %277 = vsyncadd [#allocation4 + $0x1], 2048 }
  0x44   : > { %1571 = dma.done.wait [#allocation4 + $0x1], 2048 }
  0x45   : > { %1572 = vsyncadd [#allocation4 + $0x1], 4294965248 }
  0x46   : > { %1573 = dma.done.wait [#allocation4], 4096 }
  0x47   : > { %1574 = vsyncadd [#allocation4], 4294963200 }
  0x48 PF: > { %v1406_v48 = vld [vmem:[%s1626_s24 + $0x38] sm:$0xff]  ;;  %v1405_v49 = vld [vmem:[%s1626_s24 + $0x30] sm:$0xff]  ;;  %v1404_v50 = vld [vmem:[%s1626_s24 + $0x28] sm:$0xff]  ;;  %p1377_p5 = scmp.ne.s32.totalorder %s1610_s16, 2 }
  0x49   : > { %477 = vmatpush.bf16.msra.mxu0 %v1406_v48  ;;  %1534 = vmatpush.bf16.msra.mxu3 %v1406_v48  ;;  %v1403_v51 = vld [vmem:[%s1626_s24 + $0x20] sm:$0xff]  ;;  %v1402_v52 = vld [vmem:[%s1626_s24 + $0x18] sm:$0xff]  ;;  %v1401_v53 = vld [vmem:[%s1626_s24 + $0x10] sm:$0xff] }
  0x4a   : > { %v1400_v54 = vld [vmem:[%s1626_s24 + $0x8] sm:$0xff]  ;;  %v1399_v55 = vld [vmem:[%s1626_s24] sm:$0xff]  ;;  %v1383_v56 = vld [vmem:[#allocation3 + $0x30] sm:$0xff] }
  0x4b   : > { %v1395_v57 = vld [vmem:[#allocation3 + $0x60] sm:$0xff]  ;;  %v1396_v59 = vld [vmem:[#allocation3 + $0x70] sm:$0xff]  ;;  %v1385_v60 = vld [vmem:[#allocation3 + $0x58] sm:$0xff] }
  0x4c   : > { %v1384_v58 = vld [vmem:[#allocation3] sm:$0xff]  ;;  %v1397_v61 = vld [vmem:[#allocation3 + $0x78] sm:$0xff]  ;;  %v1398_v63 = vld [vmem:[#allocation3 + $0x28] sm:$0xff] }
  0x4d   : > { %478 = vmatpush.bf16.msra.mxu0 %v1405_v49  ;;  %1535 = vmatpush.bf16.msra.mxu3 %v1405_v49  ;;  %v1386_v62 = vld [vmem:[#allocation3 + $0x18] sm:$0xff]  ;;  %v1387_v0 = vld [vmem:[#allocation3 + $0x50] sm:$0xff]  ;;  %v1388_v1 = vld [vmem:[#allocation3 + $0x68] sm:$0xff] }
  0x4e   : > { %v1389_v2 = vld [vmem:[#allocation3 + $0x8] sm:$0xff]  ;;  %v1391_v4 = vld [vmem:[#allocation3 + $0x40] sm:$0xff]  ;;  %v1393_v15 = vld [vmem:[#allocation3 + $0x10] sm:$0xff] }
  0x4f   : > { %v1390_v3 = vld [vmem:[#allocation3 + $0x48] sm:$0xff]  ;;  %v1392_v9 = vld [vmem:[#allocation3 + $0x20] sm:$0xff]  ;;  %v1394_v21 = vld [vmem:[#allocation3 + $0x38] sm:$0xff] }
  0x50   : > { %v1347_v49 = vld [vmem:[#allocation2 + $0xc0] sm:$0xf] }
  0x51   : > { %479 = vmatpush.bf16.msra.mxu0 %v1404_v50  ;;  %1536 = vmatpush.bf16.msra.mxu3 %v1404_v50  ;;  %v1432_v50 = vld [vmem:[#allocation2 + $0xc4] sm:$0xf0] }
  0x55   : > { %480 = vmatpush.bf16.msra.mxu0 %v1403_v51  ;;  %1537 = vmatpush.bf16.msra.mxu3 %v1403_v51  ;;  %v1348_v51 = vor.u32 %v1432_v50, %v1347_v49  ;;  %v1437_v49 = vld [vmem:[#allocation2 + $0xf4] sm:$0xf]  ;;  %v1373_v50 = vld [vmem:[#allocation2 + $0xf8] sm:$0xf0] }
  0x59   : > { %481 = vmatpush.bf16.msra.mxu0 %v1402_v52  ;;  %1538 = vmatpush.bf16.msra.mxu3 %v1402_v52  ;;  %v1251_v52 = vld [vmem:[#allocation2] sm:$0xf] }
  0x5d   : > { %482 = vmatpush.bf16.msra.mxu0 %v1401_v53  ;;  %1539 = vmatpush.bf16.msra.mxu3 %v1401_v53  ;;  %v1408_v53 = vld [vmem:[#allocation2 + $0x4] sm:$0xf0] }
  0x61   : > { %483 = vmatpush.bf16.msra.mxu0 %v1400_v54  ;;  %1540 = vmatpush.bf16.msra.mxu3 %v1400_v54  ;;  %v1252_v54 = vor.u32 %v1408_v53, %v1251_v52  ;;  %v1422_v52 = vld [vmem:[#allocation2 + $0x74] sm:$0xf0]  ;;  %v1376_v53 = vor.u32 %v1437_v49, %v1373_v50 }
  0x65   : > { %484 = vmatpush.bf16.msra.mxu0 %v1399_v55  ;;  %1541 = vmatpush.bf16.msra.mxu3 %v1399_v55 }
  0x68   : > { %485 = vmatmul.bf16.vlgmr.msra.gmra.mxu0 %v1383_v56  ;;  %545 = vmatmul.bf16.vlgmr.msra.gmra.mxu3 %v1395_v57  ;;  %v1355_v56 = vld [vmem:[#allocation2 + $0xd0] sm:$0xf]  ;;  %v1434_v57 = vld [vmem:[#allocation2 + $0xd4] sm:$0xf0] }
  0x78   : > { %490 = vmatmul.bf16.gmra.mxu0 %v1384_v58  ;;  %550 = vmatmul.bf16.gmra.mxu3 %v1396_v59  ;;  %v1259_v58 = vld [vmem:[#allocation2 + $0x10] sm:$0xf]  ;;  %v1410_v59 = vld [vmem:[#allocation2 + $0x14] sm:$0xf0] }
  0x88   : > { %495 = vmatmul.bf16.gmra.mxu0 %v1385_v60  ;;  %555 = vmatmul.bf16.gmra.mxu3 %v1397_v61  ;;  %v1356_v61 = vor.u32 %v1434_v57, %v1355_v56  ;;  %v1293_v56 = vld [vmem:[#allocation2 + $0x58] sm:$0xf0] }
  0x98   : > { %500 = vmatmul.bf16.gmra.mxu0 %v1386_v62  ;;  %560 = vmatmul.bf16.gmra.mxu3 %v1398_v63  ;;  %v1260_v62 = vor.u32 %v1410_v59, %v1259_v58  ;;  %v1315_v58 = vld [vmem:[#allocation2 + $0x80] sm:$0xf]  ;;  %v1424_v59 = vld [vmem:[#allocation2 + $0x84] sm:$0xf0] }
  0xa8   : > { %505 = vmatmul.bf16.gmra.mxu0 %v1387_v0 }
  0xb8   : > { %510 = vmatmul.bf16.gmra.mxu0 %v1388_v1 }
  0xc8   : > { %515 = vmatmul.bf16.gmra.mxu0 %v1389_v2  ;;  %v1363_v2 = vld [vmem:[#allocation2 + $0xe0] sm:$0xf] }
  0xd8   : > { %520 = vmatmul.bf16.gmra.mxu0 %v1390_v3  ;;  %v1436_v3 = vld [vmem:[#allocation2 + $0xe4] sm:$0xf0] }
  0xe5   : > { %v486_v5 = vpop.f32.mrf.mxu0 }
  0xe8   : > { %525 = vmatmul.bf16.gmra.mxu0 %v1391_v4  ;;  %v1267_v4 = vld [vmem:[#allocation2 + $0x20] sm:$0xf] }
  0xeb   : > { %v546_v8 = vpop.f32.mrf.mxu3 }
  0xed   : > { %v488_v6 = vpop.f32.mrf.mxu0 }
  0xee   : > { %v598_v7 = vpack.c.bf16 %v488_v6, %v486_v5  ;;  %v1412_v5 = vld [vmem:[#allocation2 + $0x24] sm:$0xf0] }
  0xf3   : > { %v548_v11 = vpop.f32.mrf.mxu3 }
  0xf4   : > { %v610_v33 = vpack.c.bf16 %v548_v11, %v546_v8  ;;  %v1268_v8 = vor.u32 %v1412_v5, %v1267_v4  ;;  %v1421_v4 = vld [vmem:[#allocation2 + $0x74] sm:$0xf]  ;;  %v1309_v5 = vld [vmem:[#allocation2 + $0x78] sm:$0xf0] }
  0xf5   : > { %v491_v10 = vpop.f32.mrf.mxu0 }
  0xf8   : > { %530 = vmatmul.bf16.gmra.mxu0 %v1392_v9  ;;  %v1407_v9 = vld [vmem:[#allocation2 + $0x4] sm:$0xf] }
  0xfb   : > { %v551_v14 = vpop.f32.mrf.mxu3 }
  0xfd   : > { %v493_v12 = vpop.f32.mrf.mxu0 }
  0xfe   : > { %v599_v13 = vpack.c.bf16 %v493_v12, %v491_v10  ;;  %v1253_v10 = vld [vmem:[#allocation2 + $0x8] sm:$0xf0] }
  0xff   : > { %v1256_v12 = vor.u32 %v1407_v9, %v1253_v10  ;;  %v1312_v10 = vor.u32 %v1421_v4, %v1309_v5  ;;  %v1341_v4 = vld [vmem:[#allocation2 + $0xb8] sm:$0xf0] }
 0x103   : > { %v553_v17 = vpop.f32.mrf.mxu3 }
 0x104   : > { %v611_v32 = vpack.c.bf16 %v553_v17, %v551_v14  ;;  %v1438_v14 = vld [vmem:[#allocation2 + $0xf4] sm:$0xf0] }
 0x105   : > { %v496_v16 = vpop.f32.mrf.mxu0 }
 0x108   : > { %535 = vmatmul.bf16.gmra.mxu0 %v1393_v15  ;;  %v1275_v15 = vld [vmem:[#allocation2 + $0x30] sm:$0xf] }
 0x10b   : > { %v556_v20 = vpop.f32.mrf.mxu3 }
 0x10d   : > { %v498_v18 = vpop.f32.mrf.mxu0 }
 0x10e   : > { %v600_v19 = vpack.c.bf16 %v498_v18, %v496_v16  ;;  %v1414_v16 = vld [vmem:[#allocation2 + $0x34] sm:$0xf0] }
 0x10f   : > { %v1276_v18 = vor.u32 %v1414_v16, %v1275_v15  ;;  %v1317_v15 = vld [vmem:[#allocation2 + $0x88] sm:$0xf0] }
 0x113   : > { %v558_v23 = vpop.f32.mrf.mxu3 }
 0x114   : > { %v612_v30 = vpack.c.bf16 %v558_v23, %v556_v20  ;;  %v1261_v20 = vld [vmem:[#allocation2 + $0x18] sm:$0xf0]  ;;  %v1349_v23 = vld [vmem:[#allocation2 + $0xc8] sm:$0xf0] }
 0x115   : > { %v501_v22 = vpop.f32.mrf.mxu0 }
 0x118   : > { %540 = vmatmul.bf16.gmra.mxu0 %v1394_v21 }
 0x11b   : > { %v561_v26 = vpop.f32.mrf.mxu3 }
 0x11d   : > { %v503_v24 = vpop.f32.mrf.mxu0 }
 0x11e   : > { %v601_v25 = vpack.c.bf16 %v503_v24, %v501_v22  ;;  %v1431_v22 = vld [vmem:[#allocation2 + $0xc4] sm:$0xf]  ;;  %v1283_v24 = vld [vmem:[#allocation2 + $0x40] sm:$0xf] }
 0x123   : > { %v563_v28 = vpop.f32.mrf.mxu3 }
 0x124   : > { %v613_v29 = vpack.c.bf16 %v563_v28, %v561_v26  ;;  %v1352_v26 = vor.u32 %v1431_v22, %v1349_v23  ;;  %v1411_v28 = vld [vmem:[#allocation2 + $0x24] sm:$0xf]  ;;  %v1796_v22 = vld [vmem:[%s144_s21] ss:$0 sm:$0xff] }
 0x125   : > { %v506_v27 = vpop.f32.mrf.mxu0 }
 0x126   : > { %867 = vmatpush.bf16.msra.mxu2 %v613_v29 }
 0x12a   : > { %868 = vmatpush.bf16.msra.mxu2 %v612_v30 }
 0x12d   : > { %v508_v31 = vpop.f32.mrf.mxu0 }
 0x12e   : > { %869 = vmatpush.bf16.msra.mxu2 %v611_v32  ;;  %v602_v44 = vpack.c.bf16 %v508_v31, %v506_v27  ;;  %v1433_v31 = vld [vmem:[#allocation2 + $0xd4] sm:$0xf] }
 0x132   : > { %870 = vmatpush.bf16.msra.mxu2 %v610_v33 }
 0x135   : > { %v511_v34 = vpop.f32.mrf.mxu0 }
 0x13d   : > { %v513_v35 = vpop.f32.mrf.mxu0 }
 0x13e   : > { %v603_v43 = vpack.c.bf16 %v513_v35, %v511_v34  ;;  %v1418_v34 = vld [vmem:[#allocation2 + $0x54] sm:$0xf0] }
 0x145   : > { %v516_v36 = vpop.f32.mrf.mxu0 }
 0x14d   : > { %v518_v37 = vpop.f32.mrf.mxu0 }
 0x14e   : > { %v604_v41 = vpack.c.bf16 %v518_v37, %v516_v36  ;;  %v1413_v37 = vld [vmem:[#allocation2 + $0x34] sm:$0xf] }
 0x155   : > { %v521_v38 = vpop.f32.mrf.mxu0 }
 0x15d   : > { %v523_v39 = vpop.f32.mrf.mxu0 }
 0x15e   : > { %v605_v40 = vpack.c.bf16 %v523_v39, %v521_v38  ;;  %v1277_v38 = vld [vmem:[#allocation2 + $0x38] sm:$0xf0] }
 0x15f   : > { %v1280_v39 = vor.u32 %v1413_v37, %v1277_v38 }
 0x160   : > { %778 = vmatpush.bf16.msra.mxu1 %v605_v40  ;;  %1542 = vmatpush.bf16.msrb.mxu3 %v605_v40  ;;  %v1435_v40 = vld [vmem:[#allocation2 + $0xe4] sm:$0xf] }
 0x164   : > { %779 = vmatpush.bf16.msra.mxu1 %v604_v41  ;;  %1543 = vmatpush.bf16.msrb.mxu3 %v604_v41  ;;  %v1365_v41 = vld [vmem:[#allocation2 + $0xe8] sm:$0xf0] }
 0x165   : > { %v526_v42 = vpop.f32.mrf.mxu0 }
 0x168   : > { %780 = vmatpush.bf16.msra.mxu1 %v603_v43  ;;  %1544 = vmatpush.bf16.msrb.mxu3 %v603_v43  ;;  %v1420_v43 = vld [vmem:[#allocation2 + $0x64] sm:$0xf0] }
 0x16c   : > { %781 = vmatpush.bf16.msra.mxu1 %v602_v44  ;;  %1545 = vmatpush.bf16.msrb.mxu3 %v602_v44  ;;  %v1368_v44 = vor.u32 %v1435_v40, %v1365_v41 }
 0x16d   : > { %v528_v45 = vpop.f32.mrf.mxu0 }
 0x16e   : > { %v606_v11 = vpack.c.bf16 %v528_v45, %v526_v42  ;;  %v1299_v42 = vld [vmem:[#allocation2 + $0x60] sm:$0xf] }
 0x16f   : > { %v1300_v45 = vor.u32 %v1420_v43, %v1299_v42 }
 0x170   : > { %782 = vmatpush.bf16.msra.mxu1 %v601_v25  ;;  %1546 = vmatpush.bf16.msrb.mxu3 %v601_v25  ;;  %v1416_v25 = vld [vmem:[#allocation2 + $0x44] sm:$0xf0] }
 0x171   : > { %v1284_v27 = vor.u32 %v1416_v25, %v1283_v24 }
 0x174   : > { %783 = vmatpush.bf16.msra.mxu1 %v600_v19  ;;  %1547 = vmatpush.bf16.msrb.mxu3 %v600_v19  ;;  %v1409_v19 = vld [vmem:[#allocation2 + $0x14] sm:$0xf] }
 0x175   : > { %v531_v46 = vpop.f32.mrf.mxu0  ;;  %v1264_v21 = vor.u32 %v1409_v19, %v1261_v20 }
 0x178   : > { %784 = vmatpush.bf16.msra.mxu1 %v599_v13  ;;  %1548 = vmatpush.bf16.msrb.mxu3 %v599_v13  ;;  %v1371_v13 = vld [vmem:[#allocation2 + $0xf0] sm:$0xf] }
 0x179   : > { %v1372_v17 = vor.u32 %v1438_v14, %v1371_v13  ;;  %v1423_v14 = vld [vmem:[#allocation2 + $0x84] sm:$0xf] }
 0x17a   : > { %v1320_v20 = vor.u32 %v1423_v14, %v1317_v15 }
 0x17c   : > { %785 = vmatpush.bf16.msra.mxu1 %v598_v7  ;;  %1549 = vmatpush.bf16.msrb.mxu3 %v598_v7  ;;  %v1364_v7 = vor.u32 %v1436_v3, %v1363_v2 }
 0x17d   : > { %v533_v47 = vpop.f32.mrf.mxu0 }
 0x17e   : > { %v607_v6 = vpack.c.bf16 %v533_v47, %v531_v46  ;;  %v1415_v46 = vld [vmem:[#allocation2 + $0x44] sm:$0xf]  ;;  %v1285_v47 = vld [vmem:[#allocation2 + $0x48] sm:$0xf0] }
 0x17f   : > { %846 = vmatmul.bf16.vlgmr.msrb.gmra.mxu3 %v1348_v51  ;;  %786 = vmatmul.bf16.vlgmr.msra.gmra.mxu1 %v1252_v54  ;;  %v1307_v51 = vld [vmem:[#allocation2 + $0x70] sm:$0xf] }
 0x180   : > { %1550 = vmatpush.bf16.msra.mxu3 %v613_v29  ;;  %v1269_v29 = vld [vmem:[#allocation2 + $0x28] sm:$0xf0]  ;;  %v1308_v54 = vor.u32 %v1422_v52, %v1307_v51 }
 0x184   : > { %1551 = vmatpush.bf16.msra.mxu3 %v612_v30  ;;  %v1272_v30 = vor.u32 %v1411_v28, %v1269_v29  ;;  %v1325_v28 = vld [vmem:[#allocation2 + $0x98] sm:$0xf0]  ;;  %v1339_v29 = vld [vmem:[#allocation2 + $0xb0] sm:$0xf] }
 0x185   : > { %v536_v48 = vpop.f32.mrf.mxu0 }
 0x188   : > { %1552 = vmatpush.bf16.msra.mxu3 %v611_v32  ;;  %v1357_v32 = vld [vmem:[#allocation2 + $0xd8] sm:$0xf0] }
 0x189   : > { %v1360_v35 = vor.u32 %v1433_v31, %v1357_v32 }
 0x18c   : > { %1553 = vmatpush.bf16.msra.mxu3 %v610_v33  ;;  %v1291_v33 = vld [vmem:[#allocation2 + $0x50] sm:$0xf] }
 0x18d   : > { %v538_v55 = vpop.f32.mrf.mxu0  ;;  %v1292_v36 = vor.u32 %v1418_v34, %v1291_v33 }
 0x18e   : > { %v608_v1 = vpack.c.bf16 %v538_v55, %v536_v48  ;;  %v1288_v48 = vor.u32 %v1415_v46, %v1285_v47  ;;  %v1417_v55 = vld [vmem:[#allocation2 + $0x54] sm:$0xf]  ;;  %v1427_v46 = vld [vmem:[#allocation2 + $0xa4] sm:$0xf]  ;;  %v1333_v47 = vld [vmem:[#allocation2 + $0xa8] sm:$0xf0] }
 0x18f   : > { %851 = vmatmul.bf16.gmra.mxu3 %v1356_v61  ;;  %791 = vmatmul.bf16.gmra.mxu1 %v1260_v62  ;;  %v1296_v57 = vor.u32 %v1417_v55, %v1293_v56  ;;  %v1419_v61 = vld [vmem:[#allocation2 + $0x64] sm:$0xf]  ;;  %v1301_v62 = vld [vmem:[#allocation2 + $0x68] sm:$0xf0]  ;;  %v1336_v52 = vor.u32 %v1427_v46, %v1333_v47 }
 0x195   : > { %v541_v60 = vpop.f32.mrf.mxu0 }
 0x19d   : > { %v543_v63 = vpop.f32.mrf.mxu0 }
 0x19e   : > { %v609_v0 = vpack.c.bf16 %v543_v63, %v541_v60  ;;  %v1316_v60 = vor.u32 %v1424_v59, %v1315_v58 }
 0x19f   : > { %856 = vmatmul.bf16.gmra.mxu3 %v1364_v7  ;;  %796 = vmatmul.bf16.gmra.mxu1 %v1268_v8  ;;  %v1323_v7 = vld [vmem:[#allocation2 + $0x90] sm:$0xf]  ;;  %v1426_v8 = vld [vmem:[#allocation2 + $0x94] sm:$0xf0] }
 0x1a0   : > { %871 = vmatpush.bf16.msra.mxu2 %v609_v0  ;;  %1554 = vmatpush.bf16.msra.mxu3 %v609_v0  ;;  %v1304_v0 = vor.u32 %v1419_v61, %v1301_v62  ;;  %v1324_v9 = vor.u32 %v1426_v8, %v1323_v7 }
 0x1a4   : > { %872 = vmatpush.bf16.msra.mxu2 %v608_v1  ;;  %1555 = vmatpush.bf16.msra.mxu3 %v608_v1 }
 0x1a8   : > { %873 = vmatpush.bf16.msra.mxu2 %v607_v6  ;;  %1556 = vmatpush.bf16.msra.mxu3 %v607_v6 }
 0x1ac   : > { %874 = vmatpush.bf16.msra.mxu2 %v606_v11  ;;  %1557 = vmatpush.bf16.msra.mxu3 %v606_v11 }
 0x1af   : > { %875 = vmatmul.bf16.vlgmr.msra.gmra.mxu2 %v1256_v12  ;;  %861 = vmatmul.bf16.gmra.mxu3 %v1372_v17  ;;  %v1331_v17 = vld [vmem:[#allocation2 + $0xa0] sm:$0xf] }
 0x1b0   : > { %801 = vmatmul.bf16.gmra.mxu1 %v1276_v18  ;;  %v1428_v18 = vld [vmem:[#allocation2 + $0xa4] sm:$0xf0] }
 0x1b1   : > { %v1332_v19 = vor.u32 %v1428_v18, %v1331_v17 }
 0x1bf   : > { %880 = vmatmul.bf16.gmra.mxu2 %v1264_v21  ;;  %935 = vmatmul.bf16.vlgmr.msra.gmra.mxu3 %v1352_v26 }
 0x1c0   : > { %806 = vmatmul.bf16.gmra.mxu1 %v1284_v27  ;;  %v1425_v27 = vld [vmem:[#allocation2 + $0x94] sm:$0xf] }
 0x1cf   : > { %885 = vmatmul.bf16.gmra.mxu2 %v1272_v30  ;;  %940 = vmatmul.bf16.gmra.mxu3 %v1360_v35  ;;  %v1430_v30 = vld [vmem:[#allocation2 + $0xb4] sm:$0xf0] }
 0x1d0   : > { %811 = vmatmul.bf16.gmra.mxu1 %v1292_v36  ;;  %v1340_v33 = vor.u32 %v1430_v30, %v1339_v29  ;;  %v1328_v36 = vor.u32 %v1425_v27, %v1325_v28 }
 0x1df   : > { %890 = vmatmul.bf16.gmra.mxu2 %v1280_v39  ;;  %945 = vmatmul.bf16.gmra.mxu3 %v1368_v44 }
 0x1e0   : > { %816 = vmatmul.bf16.gmra.mxu1 %v1300_v45 }
 0x1ef   : > { %895 = vmatmul.bf16.gmra.mxu2 %v1288_v48  ;;  %950 = vmatmul.bf16.gmra.mxu3 %v1376_v53 }
 0x1f0   : > { %821 = vmatmul.bf16.gmra.mxu1 %v1308_v54 }
 0x1fc   : > { %v787_v63 = vpop.f32.mrf.mxu1 }
 0x1fd   : > { %v788_v25 = vadd.f32 %v1796_v22, %v787_v63 }
 0x1ff   : > { %900 = vmatmul.bf16.gmra.mxu2 %v1296_v57 }
 0x200   : > { %826 = vmatmul.bf16.gmra.mxu1 %v1316_v60 }
 0x202   : > { %v1781_v1 = vpop.f32.mrf.mxu3 }
 0x203   : > { %v848_v56 = vadd.f32 %v1796_v22, %v1781_v1 }
 0x204   : > { %v789_v2 = vpop.f32.mrf.mxu1 }
 0x205   : > { %v790_v31 = vadd.f32 %v1796_v22, %v789_v2  ;;  %v1429_v2 = vld [vmem:[#allocation2 + $0xb4] sm:$0xf] }
 0x20a   : > { %v1783_v3 = vpop.f32.mrf.mxu3 }
 0x20b   : > { %v850_v59 = vadd.f32 %v1796_v22, %v1783_v3 }
 0x20c   : > { %v792_v6 = vpop.f32.mrf.mxu1 }
 0x20d   : > { %v793_v43 = vadd.f32 %v1796_v22, %v792_v6 }
 0x20f   : > { %905 = vmatmul.bf16.gmra.mxu2 %v1304_v0 }
 0x210   : > { %831 = vmatmul.bf16.gmra.mxu1 %v1324_v9 }
 0x212   : > { %v1785_v11 = vpop.f32.mrf.mxu3 }
 0x213   : > { %v853_v17 = vadd.f32 %v1796_v22, %v1785_v11 }
 0x214   : > { %v794_v12 = vpop.f32.mrf.mxu1 }
 0x215   : > { %v795_v48 = vadd.f32 %v1796_v22, %v794_v12  ;;  %v1344_v12 = vor.u32 %v1429_v2, %v1341_v4 }
 0x21a   : > { %v1787_v13 = vpop.f32.mrf.mxu3 }
 0x21c   : > { %v797_v16 = vpop.f32.mrf.mxu1 }
 0x21d   : > { %v798_v62 = vadd.f32 %v1796_v22, %v797_v16 }
 0x21f   : > { %910 = vmatmul.bf16.gmra.mxu2 %v1312_v10 }
 0x220   : > { %836 = vmatmul.bf16.gmra.mxu1 %v1332_v19  ;;  %v855_v19 = vadd.f32 %v1796_v22, %v1787_v13 }
 0x222   : > { %v1789_v21 = vpop.f32.mrf.mxu3 }
 0x224   : > { %v799_v24 = vpop.f32.mrf.mxu1 }
 0x225   : > { %v800_v6 = vadd.f32 %v1796_v22, %v799_v24 }
 0x22a   : > { %v1799_v26 = vpop.f32.mrf.mxu3 }
 0x22b   : > { %v860_v46 = vadd.f32 %v1796_v22, %v1799_v26 }
 0x22d   : > { %v802_v37 = vpop.f32.mrf.mxu1 }
 0x22f   : > { %915 = vmatmul.bf16.gmra.mxu2 %v1320_v20 }
 0x230   : > { %841 = vmatmul.bf16.gmra.mxu1 %v1340_v33 }
 0x232   : > { %v876_v23 = vpop.f32.mrf.mxu2  ;;  %v1808_v40 = vpop.f32.mrf.mxu3 }
 0x233   : > { %v1802_v32 = vadd.f32 %v876_v23, %v788_v25  ;;  %v803_v25 = vadd.f32 %v1796_v22, %v802_v37 }
 0x235   : > { %v956_v38 = vmax.f32 %v1802_v32, 0.0  ;;  %v804_v45 = vpop.f32.mrf.mxu1 }
 0x236   : > { %v805_v30 = vadd.f32 %v1796_v22, %v804_v45 }
 0x23a   : > { %v878_v34 = vpop.f32.mrf.mxu2  ;;  %v1815_v44 = vpop.f32.mrf.mxu3 }
 0x23b   : > { %v1804_v35 = vadd.f32 %v878_v34, %v790_v31 }
 0x23d   : > { %v957_v39 = vmax.f32 %v1804_v35, 0.0  ;;  %v807_v58 = vpop.f32.mrf.mxu1 }
 0x23f   : > { %v1442_v41 = vpack.c.bf16 %v957_v39, %v956_v38  ;;  %920 = vmatmul.bf16.gmra.mxu2 %v1328_v36 }
 0x241   : > { %1443 = vst [vmem:[#allocation3 + $0x30] sm:$0xff] %v1442_v41  }
 0x242   : > { %v881_v42 = vpop.f32.mrf.mxu2  ;;  %v936_v55 = vpop.f32.mrf.mxu3 }
 0x243   : > { %v1818_v49 = vadd.f32 %v881_v42, %v793_v43  ;;  %v1832_v61 = vadd.f32 %v936_v55, %v848_v56  ;;  %v858_v42 = vadd.f32 %v1796_v22, %v1789_v21 }
 0x245   : > { %v958_v53 = vmax.f32 %v1818_v49, 0.0  ;;  %v2124_v0 = vmax.f32 %v1832_v61, 0.0  ;;  %v809_v3 = vpop.f32.mrf.mxu1 }
 0x24a   : > { %v883_v50 = vpop.f32.mrf.mxu2  ;;  %v938_v63 = vpop.f32.mrf.mxu3 }
 0x24b   : > { %v1820_v51 = vadd.f32 %v883_v50, %v795_v48  ;;  %v1836_v1 = vadd.f32 %v938_v63, %v850_v59  ;;  %v808_v50 = vadd.f32 %v1796_v22, %v807_v58  ;;  %v810_v59 = vadd.f32 %v1796_v22, %v809_v3 }
 0x24c   : > { %v865_v3 = vadd.f32 %v1796_v22, %v1815_v44 }
 0x24d   : > { %v959_v54 = vmax.f32 %v1820_v51, 0.0  ;;  %v2123_v5 = vmax.f32 %v1836_v1, 0.0  ;;  %v812_v24 = vpop.f32.mrf.mxu1 }
 0x24f   : > { %v1447_v57 = vpack.c.bf16 %v959_v54, %v958_v53  ;;  %925 = vmatmul.bf16.gmra.mxu2 %v1336_v52  ;;  %v1502_v9 = vpack.c.bf16 %v2123_v5, %v2124_v0 }
 0x251   : > { %1519 = vst [vmem:[#allocation3] sm:$0xff] %v1447_v57  }
 0x252   : > { %v886_v60 = vpop.f32.mrf.mxu2  ;;  %1530 = vst [vmem:[#allocation3 + $0x60] sm:$0xff] %v1502_v9   ;;  %v941_v16 = vpop.f32.mrf.mxu3 }
 0x253   : > { %v1840_v7 = vadd.f32 %v886_v60, %v798_v62  ;;  %v1858_v23 = vadd.f32 %v941_v16, %v853_v17  ;;  %v813_v17 = vadd.f32 %v1796_v22, %v812_v24 }
 0x255   : > { %v960_v14 = vmax.f32 %v1840_v7, 0.0  ;;  %v2122_v28 = vmax.f32 %v1858_v23, 0.0  ;;  %v814_v43 = vpop.f32.mrf.mxu1 }
 0x25a   : > { %v888_v8 = vpop.f32.mrf.mxu2  ;;  %v943_v27 = vpop.f32.mrf.mxu3 }
 0x25b   : > { %v1846_v10 = vadd.f32 %v888_v8, %v800_v6  ;;  %v1862_v11 = vadd.f32 %v943_v27, %v855_v19  ;;  %v863_v6 = vadd.f32 %v1796_v22, %v1808_v40 }
 0x25d   : > { %v961_v15 = vmax.f32 %v1846_v10, 0.0  ;;  %v2121_v29 = vmax.f32 %v1862_v11, 0.0  ;;  %v817_v21 = vpop.f32.mrf.mxu1 }
 0x25f   : > { %v1452_v18 = vpack.c.bf16 %v961_v15, %v960_v14  ;;  %930 = vmatmul.bf16.gmra.mxu2 %v1344_v12  ;;  %v1507_v13 = vpack.c.bf16 %v2121_v29, %v2122_v28 }
 0x261   : > { %1520 = vst [vmem:[#allocation3 + $0x58] sm:$0xff] %v1452_v18  }
 0x262   : > { %v891_v20 = vpop.f32.mrf.mxu2  ;;  %1531 = vst [vmem:[#allocation3 + $0x70] sm:$0xff] %v1507_v13   ;;  %v946_v41 = vpop.f32.mrf.mxu3 }
 0x263   : > { %v1866_v31 = vadd.f32 %v891_v20, %v803_v25  ;;  %v1884_v48 = vadd.f32 %v946_v41, %v858_v42  ;;  %v815_v25 = vadd.f32 %v1796_v22, %v814_v43 }
 0x265   : > { %v962_v36 = vmax.f32 %v1866_v31, 0.0  ;;  %v2120_v55 = vmax.f32 %v1884_v48, 0.0  ;;  %v819_v12 = vpop.f32.mrf.mxu1 }
 0x26a   : > { %v893_v33 = vpop.f32.mrf.mxu2  ;;  %v948_v52 = vpop.f32.mrf.mxu3 }
 0x26b   : > { %v1872_v34 = vadd.f32 %v893_v33, %v805_v30  ;;  %v1888_v56 = vadd.f32 %v948_v52, %v860_v46 }
 0x26d   : > { %v963_v37 = vmax.f32 %v1872_v34, 0.0  ;;  %v2119_v57 = vmax.f32 %v1888_v56, 0.0  ;;  %v822_v24 = vpop.f32.mrf.mxu1 }
 0x26f   : > { %v1457_v45 = vpack.c.bf16 %v963_v37, %v962_v36  ;;  %v1512_v26 = vpack.c.bf16 %v2119_v57, %v2120_v55 }
 0x271   : > { %1521 = vst [vmem:[#allocation3 + $0x18] sm:$0xff] %v1457_v45   ;;  %v818_v45 = vadd.f32 %v1796_v22, %v817_v21 }
 0x272   : > { %v896_v47 = vpop.f32.mrf.mxu2  ;;  %1532 = vst [vmem:[#allocation3 + $0x78] sm:$0xff] %v1512_v26   ;;  %v951_v4 = vpop.f32.mrf.mxu3 }
 0x273   : > { %v1892_v60 = vadd.f32 %v896_v47, %v808_v50  ;;  %v1910_v16 = vadd.f32 %v951_v4, %v863_v6  ;;  %v820_v47 = vadd.f32 %v1796_v22, %v819_v12 }
 0x275   : > { %v964_v58 = vmax.f32 %v1892_v60, 0.0  ;;  %v2118_v19 = vmax.f32 %v1910_v16, 0.0  ;;  %v824_v46 = vpop.f32.mrf.mxu1 }
 0x27a   : > { %v898_v62 = vpop.f32.mrf.mxu2  ;;  %v953_v18 = vpop.f32.mrf.mxu3 }
 0x27b   : > { %v1898_v63 = vadd.f32 %v898_v62, %v810_v59  ;;  %v1914_v20 = vadd.f32 %v953_v18, %v865_v3  ;;  %v825_v3 = vadd.f32 %v1796_v22, %v824_v46 }
 0x27d   : > { %v965_v2 = vmax.f32 %v1898_v63, 0.0  ;;  %v2117_v40 = vmax.f32 %v1914_v20, 0.0  ;;  %v827_v6 = vpop.f32.mrf.mxu1 }
 0x27f   : > { %v1462_v8 = vpack.c.bf16 %v965_v2, %v964_v58  ;;  %v1517_v44 = vpack.c.bf16 %v2117_v40, %v2118_v19 }
 0x281   : > { %1522 = vst [vmem:[#allocation3 + $0x50] sm:$0xff] %v1462_v8   ;;  %v823_v8 = vadd.f32 %v1796_v22, %v822_v24 }
 0x282   : > { %v901_v9 = vpop.f32.mrf.mxu2  ;;  %1533 = vst [vmem:[#allocation3 + $0x28] sm:$0xff] %v1517_v44  }
 0x283   : > { %v1918_v27 = vadd.f32 %v901_v9, %v813_v17 }
 0x285   : > { %v966_v13 = vmax.f32 %v1918_v27, 0.0  ;;  %v829_v17 = vpop.f32.mrf.mxu1 }
 0x28a   : > { %v903_v30 = vpop.f32.mrf.mxu2 }
 0x28b   : > { %v1924_v33 = vadd.f32 %v903_v30, %v815_v25 }
 0x28d   : > { %v967_v41 = vmax.f32 %v1924_v33, 0.0  ;;  %v832_v24 = vpop.f32.mrf.mxu1 }
 0x28e   : > { %v833_v40 = vadd.f32 %v1796_v22, %v832_v24 }
 0x28f   : > { %v1467_v42 = vpack.c.bf16 %v967_v41, %v966_v13 }
 0x291   : > { %1523 = vst [vmem:[#allocation3 + $0x68] sm:$0xff] %v1467_v42  }
 0x292   : > { %v906_v43 = vpop.f32.mrf.mxu2 }
 0x293   : > { %v1934_v50 = vadd.f32 %v906_v43, %v818_v45  ;;  %v828_v43 = vadd.f32 %v1796_v22, %v827_v6  ;;  %v830_v45 = vadd.f32 %v1796_v22, %v829_v17 }
 0x295   : > { %v968_v62 = vmax.f32 %v1934_v50, 0.0 }
 0x29a   : > { %v908_v52 = vpop.f32.mrf.mxu2 }
 0x29b   : > { %v1936_v59 = vadd.f32 %v908_v52, %v820_v47 }
 0x29d   : > { %v969_v26 = vmax.f32 %v1936_v59, 0.0 }
 0x29f   : > { %v1472_v4 = vpack.c.bf16 %v969_v26, %v968_v62 }
 0x2a1   : > { %1524 = vst [vmem:[#allocation3 + $0x8] sm:$0xff] %v1472_v4  }
 0x2a2   : > { %v911_v21 = vpop.f32.mrf.mxu2 }
 0x2a3   : > { %v1946_v9 = vadd.f32 %v911_v21, %v823_v8  ;;  %v834_v8 = vpop.f32.mrf.mxu1 }
 0x2a5   : > { %v970_v25 = vmax.f32 %v1946_v9, 0.0 }
 0x2aa   : > { %v913_v12 = vpop.f32.mrf.mxu2 }
 0x2ab   : > { %v1948_v18 = vadd.f32 %v913_v12, %v825_v3  ;;  %v837_v19 = vpop.f32.mrf.mxu1 }
 0x2ad   : > { %v2125_v30 = vmax.f32 %v1948_v18, 0.0 }
 0x2af   : > { %v1477_v44 = vpack.c.bf16 %v2125_v30, %v970_v25 }
 0x2b1   : > { %1525 = vst [vmem:[#allocation3 + $0x48] sm:$0xff] %v1477_v44   ;;  %v835_v44 = vadd.f32 %v1796_v22, %v834_v8 }
 0x2b2   : > { %v916_v42 = vpop.f32.mrf.mxu2 }
 0x2b3   : > { %v917_v46 = vadd.f32 %v916_v42, %v828_v43  ;;  %v839_v42 = vpop.f32.mrf.mxu1 }
 0x2b5   : > { %v972_v4 = vmax.f32 %v917_v46, 0.0  ;;  %v840_v46 = vadd.f32 %v1796_v22, %v839_v42 }
 0x2ba   : > { %v918_v47 = vpop.f32.mrf.mxu2 }
 0x2bb   : > { %v919_v52 = vadd.f32 %v918_v47, %v830_v45  ;;  %v838_v45 = vadd.f32 %v1796_v22, %v837_v19  ;;  %v842_v24 = vpop.f32.mrf.mxu1 }
 0x2bd   : > { %v973_v21 = vmax.f32 %v919_v52, 0.0 }
 0x2bf   : > { %v1482_v3 = vpack.c.bf16 %v973_v21, %v972_v4 }
 0x2c1   : > { %1526 = vst [vmem:[#allocation3 + $0x40] sm:$0xff] %v1482_v3  }
 0x2c2   : > { %v921_v12 = vpop.f32.mrf.mxu2 }
 0x2c3   : > { %v922_v57 = vadd.f32 %v921_v12, %v833_v40 }
 0x2c5   : > { %v974_v6 = vmax.f32 %v922_v57, 0.0 }
 0x2ca   : > { %v923_v55 = vpop.f32.mrf.mxu2 }
 0x2cb   : > { %v924_v29 = vadd.f32 %v923_v55, %v835_v44  ;;  %v843_v55 = vadd.f32 %v1796_v22, %v842_v24 }
 0x2cd   : > { %v975_v28 = vmax.f32 %v924_v29, 0.0  ;;  %v844_v29 = vpop.f32.mrf.mxu1 }
 0x2ce   : > { %v845_v57 = vadd.f32 %v1796_v22, %v844_v29 }
 0x2cf   : > { %v1487_v17 = vpack.c.bf16 %v975_v28, %v974_v6 }
 0x2d1   : > { %1527 = vst [vmem:[#allocation3 + $0x20] sm:$0xff] %v1487_v17  }
 0x2d2   : > { %v926_v43 = vpop.f32.mrf.mxu2 }
 0x2d3   : > { %v927_v47 = vadd.f32 %v926_v43, %v838_v45 }
 0x2d5   : > { %v976_v5 = vmax.f32 %v927_v47, 0.0 }
 0x2da   : > { %v928_v52 = vpop.f32.mrf.mxu2 }
 0x2db   : > { %v929_v3 = vadd.f32 %v928_v52, %v840_v46 }
 0x2dd   : > { %v977_v0 = vmax.f32 %v929_v3, 0.0 }
 0x2df   : > { %v1492_v8 = vpack.c.bf16 %v977_v0, %v976_v5 }
 0x2e1   : > { %1528 = vst [vmem:[#allocation3 + $0x10] sm:$0xff] %v1492_v8  }
 0x2e2   : > { %v931_v40 = vpop.f32.mrf.mxu2 }
 0x2e3   : > { %v932_v12 = vadd.f32 %v931_v40, %v843_v55 }
 0x2e5   : > { %v978_v19 = vmax.f32 %v932_v12, 0.0 }
 0x2ea   : > { %v933_v44 = vpop.f32.mrf.mxu2 }
 0x2eb   : > { %v934_v17 = vadd.f32 %v933_v44, %v845_v57 }
 0x2ed   : > { %v979_v30 = vmax.f32 %v934_v17, 0.0  ;;  %1055 = sbr.rel (%p1377_p5) target bundleno = 786 (0x312), region = 74 }
 0x2ef   : > { %v1497_v42 = vpack.c.bf16 %v979_v30, %v978_v19 }
 0x2f1   : > { %1529 = vst [vmem:[#allocation3 + $0x38] sm:$0xff] %v1497_v42  }
 0x2f2   : > { %1056 = vst [vmem:[%s2116_s4] sm:$0xff] %v956_v38  ;;  %v2126_v22 = vmax.f32 %v1948_v18, 0.0  ;;  %v2127_v32 = vmax.f32 %v1832_v61, 0.0  ;;  %v2128_v35 = vmax.f32 %v1836_v1, 0.0  ;;  %v2129_v38 = vmax.f32 %v1858_v23, 0.0 }
 0x2f3   : > { %1057 = vst [vmem:[%s2116_s4 + $0x8] sm:$0xff] %v957_v39  ;;  %v2130_v39 = vmax.f32 %v1862_v11, 0.0  ;;  %v2131_v49 = vmax.f32 %v1884_v48, 0.0  ;;  %v2132_v51 = vmax.f32 %v1888_v56, 0.0 }
 0x2f4   : > { %1058 = vst [vmem:[%s2116_s4 + $0x10] sm:$0xff] %v958_v53  ;;  %v2133_v53 = vmax.f32 %v1910_v16, 0.0 }
 0x2f5   : > { %1059 = vst [vmem:[%s2116_s4 + $0x18] sm:$0xff] %v959_v54  ;;  %v2134_v54 = vmax.f32 %v1914_v20, 0.0 }
 0x2f6   : > { %1060 = vst [vmem:[%s2116_s4 + $0x20] sm:$0xff] %v960_v14 }
 0x2f7   : > { %1061 = vst [vmem:[%s2116_s4 + $0x28] sm:$0xff] %v961_v15 }
 0x2f8   : > { %1062 = vst [vmem:[%s2116_s4 + $0x30] sm:$0xff] %v962_v36 }
 0x2f9   : > { %1063 = vst [vmem:[%s2116_s4 + $0x38] sm:$0xff] %v963_v37 }
 0x2fa   : > { %1064 = vst [vmem:[%s2116_s4 + $0x40] sm:$0xff] %v964_v58 }
 0x2fb   : > { %1065 = vst [vmem:[%s2116_s4 + $0x48] sm:$0xff] %v965_v2 }
 0x2fc   : > { %1066 = vst [vmem:[%s2116_s4 + $0x50] sm:$0xff] %v966_v13 }
 0x2fd   : > { %1067 = vst [vmem:[%s2116_s4 + $0x58] sm:$0xff] %v967_v41 }
 0x2fe   : > { %1068 = vst [vmem:[%s2116_s4 + $0x60] sm:$0xff] %v968_v62 }
 0x2ff   : > { %1069 = vst [vmem:[%s2116_s4 + $0x68] sm:$0xff] %v969_v26 }
 0x300   : > { %1070 = vst [vmem:[%s2116_s4 + $0x70] sm:$0xff] %v970_v25 }
 0x301   : > { %1071 = vst [vmem:[%s2116_s4 + $0x78] sm:$0xff] %v2126_v22 }
 0x302   : > { %1072 = vst [vmem:[%s2116_s4 + $0x80] sm:$0xff] %v972_v4 }
 0x303   : > { %1073 = vst [vmem:[%s2116_s4 + $0x88] sm:$0xff] %v973_v21 }
 0x304   : > { %1074 = vst [vmem:[%s2116_s4 + $0x90] sm:$0xff] %v974_v6 }
 0x305   : > { %1075 = vst [vmem:[%s2116_s4 + $0x98] sm:$0xff] %v975_v28 }
 0x306   : > { %1076 = vst [vmem:[%s2116_s4 + $0xa0] sm:$0xff] %v976_v5 }
 0x307   : > { %1077 = vst [vmem:[%s2116_s4 + $0xa8] sm:$0xff] %v977_v0 }
 0x308   : > { %1078 = vst [vmem:[%s2116_s4 + $0xb0] sm:$0xff] %v978_v19 }
 0x309   : > { %1079 = vst [vmem:[%s2116_s4 + $0xb8] sm:$0xff] %v979_v30 }
 0x30a   : > { %1080 = vst [vmem:[%s2116_s4 + $0xc0] sm:$0xff] %v2127_v32 }
 0x30b   : > { %1081 = vst [vmem:[%s2116_s4 + $0xc8] sm:$0xff] %v2128_v35 }
 0x30c   : > { %1082 = vst [vmem:[%s2116_s4 + $0xd0] sm:$0xff] %v2129_v38 }
 0x30d   : > { %1083 = vst [vmem:[%s2116_s4 + $0xd8] sm:$0xff] %v2130_v39 }
 0x30e   : > { %1084 = vst [vmem:[%s2116_s4 + $0xe0] sm:$0xff] %v2131_v49 }
 0x30f   : > { %1085 = vst [vmem:[%s2116_s4 + $0xe8] sm:$0xff] %v2132_v51 }
 0x310   : > { %1086 = vst [vmem:[%s2116_s4 + $0xf0] sm:$0xff] %v2133_v53 }
 0x311   : > { %1087 = vst [vmem:[%s2116_s4 + $0xf8] sm:$0xff] %v2134_v54 }
 0x312 PF: > { %s14_s15 = sadd.s32 1, %s1577_s15  }
 0x313   : > { %p11_p6 = scmp.ge.s32.totalorder %s14_s15, 5  }
 0x315   :  { %13 = sbr.rel (!%p11_p6) target bundleno = 1 (0x1), region = 113 }
 0x31a   :  { %1099 = vsyncmov [#allocation4] }
 0x31d   :  { %s1100_s28 = vpop.sfrf %1099 }
 0x31e   :  { %p1380_p7 = scmp.ne.s32.totalorder %s1100_s28, 0 }
 0x320   :  { %1104 = shalt.err (%p1380_p7)  }
 0x321   :  { %1106 = vsyncmov [#allocation4 + $0x1] }
 0x324   :  { %s1107_s29 = vpop.sfrf %1106 }
 0x325   :  { %p1381_p8 = scmp.ne.s32.totalorder %s1107_s29, 0 }
 0x327   :  { %1111 = shalt.err (%p1381_p8)  }

</bundles_post_ra>
